<compile_context>
chip_gen: v7x
topology: tpu7x:2x2x1
jax: 0.10.0
libtpu: 0.0.40
codegen_flags: <defaults>
</compile_context>

<pallas_src>
import functools

import jax
import jax.numpy as jnp
from jax.experimental import pallas as pl
from jax.experimental.pallas import tpu as pltpu

BN_EPS = 1e-5


def _round_up(x, m):
    return ((x + m - 1) // m) * m


def residual_block_kernel(x_ref, w_ref, b_ref, scale_ref, shift_ref, o_ref):
    # MXU matmul in bf16 with f32 accumulation.
    h = jnp.dot(x_ref[...], w_ref[...], preferred_element_type=jnp.float32)
    h = h + b_ref[...]                                   # (tile_n, tile_out) + (1, tile_out)
    # Folded BN:  (h - mean) * gamma * rsqrt(var+eps) + beta  ==  h*scale + shift
    bn = h * scale_ref[...] + shift_ref[...]
    o_ref[...] = (jnp.maximum(bn, 0.0) + h).astype(o_ref.dtype)


@functools.partial(jax.jit, static_argnames=("tile_n", "tile_out"))
def residual_block(x, w_t, b, gamma, beta, running_mean, running_var,
                   *, tile_n=256, tile_out=512):
    """x: (N, in_f) f32, w_t: (in_f, out_f) f32, params: (out_f,) f32 -> (N, out_f) f32."""
    N, in_f = x.shape
    out_f = w_t.shape[1]

    # ---- Fold BatchNorm (eval mode) into a single scale/shift (done once, in f32).
    scale = gamma * jax.lax.rsqrt(running_var + BN_EPS)
    shift = beta - running_mean * scale

    # ---- Pad to TPU-friendly sizes (lane-dense: last dims multiples of 128).
    in_pad = _round_up(in_f, 128)
    out_pad = _round_up(out_f, 128)

    tile_out = min(tile_out, out_pad)
    if out_pad % tile_out != 0:
        tile_out = 128                      # 128 always divides out_pad
    tile_n = min(tile_n, _round_up(N, 8))
    tile_n = _round_up(tile_n, 8)
    n_pad = _round_up(N, tile_n)

    # Zero-padded, bf16-cast matmul operands (zero rows/cols contribute nothing).
    x_p = jnp.zeros((n_pad, in_pad), jnp.float32).at[:N, :in_f].set(x).astype(jnp.bfloat16)
    w_p = jnp.zeros((in_pad, out_pad), jnp.float32).at[:in_f, :out_f].set(w_t).astype(jnp.bfloat16)

    def pad_row(v):
        return jnp.zeros((1, out_pad), jnp.float32).at[0, :out_f].set(v)

    b_p, scale_p, shift_p = pad_row(b), pad_row(scale), pad_row(shift)

    n_tiles = n_pad // tile_n
    out_tiles = out_pad // tile_out

    # VMEM budget: double-buffered x / w / params / out tiles (+ headroom), capped for v7x.
    buf_bytes = (tile_n * in_pad * 2) + (in_pad * tile_out * 2) \
        + 3 * max(8 * 128, tile_out) * 4 + (tile_n * tile_out * 4)
    vmem_limit = min(max(4 * buf_bytes + (4 << 20), 16 << 20), 48 << 20)

    # Grid: out-feature tiles outermost (weight/params stay resident across the N sweep),
    # N tiles innermost. Both axes are fully parallel (megacore-shardable).
    param_spec = pl.BlockSpec((1, tile_out), lambda j, i: (0, j))

    out_p = pl.pallas_call(
        residual_block_kernel,
        out_shape=jax.ShapeDtypeStruct((n_pad, out_pad), jnp.float32),
        grid_spec=pltpu.PrefetchScalarGridSpec(
            num_scalar_prefetch=0,
            grid=(out_tiles, n_tiles),
            in_specs=[
                pl.BlockSpec((tile_n, in_pad), lambda j, i: (i, 0)),    # x tile
                pl.BlockSpec((in_pad, tile_out), lambda j, i: (0, j)),  # weight slab
                param_spec,   # bias
                param_spec,   # folded BN scale
                param_spec,   # folded BN shift
            ],
            out_specs=pl.BlockSpec((tile_n, tile_out), lambda j, i: (i, j)),
        ),
        compiler_params=pltpu.CompilerParams(
            dimension_semantics=("parallel", "parallel"),
            vmem_limit_bytes=vmem_limit),
    )(x_p, w_p, b_p, scale_p, shift_p)

    return out_p[:N, :out_f]


def reference_bf16(x, w_t, b, gamma, beta, running_mean, running_var):
    # Same numerics as the kernel: bf16 matmul inputs, f32 accumulation/elementwise.
    h = jnp.dot(x.astype(jnp.bfloat16), w_t.astype(jnp.bfloat16),
                preferred_element_type=jnp.float32) + b
    bn = (h - running_mean) * gamma * jax.lax.rsqrt(running_var + BN_EPS) + beta
    return jnp.maximum(bn, 0.0) + h


def reference_f32(x, w_t, b, gamma, beta, running_mean, running_var):
    h = x @ w_t + b
    bn = (h - running_mean) * gamma / jnp.sqrt(running_var + BN_EPS) + beta
    return jnp.maximum(bn, 0.0) + h


if __name__ == "__main__":
    N, in_features, out_features = 512, 32, 64

    key = jax.random.PRNGKey(0)
    kx, kw, kb, kg, kbeta, km, kv = jax.random.split(key, 7)

    x = jax.random.normal(kx, (N, in_features), dtype=jnp.float32)

    # Deterministic parameter init (PyTorch-style Linear init bounds).
    bound = 1.0 / jnp.sqrt(jnp.float32(in_features))
    w_t = jax.random.uniform(kw, (in_features, out_features),
                             minval=-bound, maxval=bound, dtype=jnp.float32)
    b = jax.random.uniform(kb, (out_features,),
                           minval=-bound, maxval=bound, dtype=jnp.float32)
    gamma = jnp.ones((out_features,), jnp.float32) + \
        0.1 * jax.random.normal(kg, (out_features,), jnp.float32)
    beta = 0.1 * jax.random.normal(kbeta, (out_features,), jnp.float32)
    running_mean = 0.1 * jax.random.normal(km, (out_features,), jnp.float32)
    running_var = jnp.ones((out_features,), jnp.float32) + \
        0.05 * jax.random.uniform(kv, (out_features,), dtype=jnp.float32)

    out = residual_block(x, w_t, b, gamma, beta, running_mean, running_var)
    out = jax.block_until_ready(out)
    assert out.shape == (N, out_features)

    ref_b = reference_bf16(x, w_t, b, gamma, beta, running_mean, running_var)
    assert jnp.allclose(out, ref_b, atol=2e-3, rtol=2e-3), "mismatch vs bf16-matmul reference"

    # Loose sanity check against the pure-f32 module math (bf16 matmul rounding only).
    ref_f = reference_f32(x, w_t, b, gamma, beta, running_mean, running_var)
    assert jnp.allclose(out, ref_f, atol=5e-2, rtol=5e-2), "mismatch vs f32 reference"

    print("KERNEL_OK")
</pallas_src>

<mosaic_0001>
module attributes {stable_mosaic.version = 11 : i64} {
  func.func @residual_block_kernel(%arg0: i32, %arg1: i32, %arg2: memref<256x128xbf16, #tpu.memory_space<vmem>>, %arg3: memref<128x128xbf16, #tpu.memory_space<vmem>>, %arg4: memref<1x128xf32, #tpu.memory_space<vmem>>, %arg5: memref<1x128xf32, #tpu.memory_space<vmem>>, %arg6: memref<1x128xf32, #tpu.memory_space<vmem>>, %arg7: memref<256x128xf32, #tpu.memory_space<vmem>>) attributes {dimension_semantics = [#tpu.dimension_semantics<parallel>, #tpu.dimension_semantics<parallel>], iteration_bounds = array<i64: 1, 2>, scalar_prefetch = 0 : i64, scratch_operands = 0 : i64, tpu.core_type = #tpu.core_type<tc>, window_params = [{transform_indices = @transform_0, window_bounds = array<i64: 256, 128>}, {transform_indices = @transform_1, window_bounds = array<i64: 128, 128>}, {transform_indices = @transform_2, window_bounds = array<i64: 1, 128>}, {transform_indices = @transform_3, window_bounds = array<i64: 1, 128>}, {transform_indices = @transform_4, window_bounds = array<i64: 1, 128>}, {transform_indices = @transform_5, window_bounds = array<i64: 256, 128>}]} {
    %c0 = arith.constant 0 : index
    %c0_0 = arith.constant 0 : index
    %0 = vector.load %arg2[%c0, %c0_0] : memref<256x128xbf16, #tpu.memory_space<vmem>>, vector<256x128xbf16>
    %c0_1 = arith.constant 0 : index
    %c0_2 = arith.constant 0 : index
    %1 = vector.load %arg3[%c0_1, %c0_2] : memref<128x128xbf16, #tpu.memory_space<vmem>>, vector<128x128xbf16>
    %cst = arith.constant dense<0.000000e+00> : vector<256x128xf32>
    %2 = tpu.matmul %0, %1, %cst {dimension_numbers = #tpu.dot_dimension_numbers<[1], [0], [0], [1], [0, 0, 1, 1], [], []>} : vector<256x128xbf16>, vector<128x128xbf16>, vector<256x128xf32> -> vector<256x128xf32>
    %c0_3 = arith.constant 0 : index
    %c0_4 = arith.constant 0 : index
    %3 = vector.load %arg4[%c0_3, %c0_4] : memref<1x128xf32, #tpu.memory_space<vmem>>, vector<1x128xf32>
    %4 = vector.broadcast %3 : vector<1x128xf32> to vector<256x128xf32>
    %5 = arith.addf %2, %4 : vector<256x128xf32>
    %c0_5 = arith.constant 0 : index
    %c0_6 = arith.constant 0 : index
    %6 = vector.load %arg5[%c0_5, %c0_6] : memref<1x128xf32, #tpu.memory_space<vmem>>, vector<1x128xf32>
    %7 = vector.broadcast %6 : vector<1x128xf32> to vector<256x128xf32>
    %8 = arith.mulf %5, %7 : vector<256x128xf32>
    %c0_7 = arith.constant 0 : index
    %c0_8 = arith.constant 0 : index
    %9 = vector.load %arg6[%c0_7, %c0_8] : memref<1x128xf32, #tpu.memory_space<vmem>>, vector<1x128xf32>
    %10 = vector.broadcast %9 : vector<1x128xf32> to vector<256x128xf32>
    %11 = arith.addf %8, %10 : vector<256x128xf32>
    %cst_9 = arith.constant 0.000000e+00 : f32
    %12 = vector.broadcast %cst_9 : f32 to vector<256x128xf32>
    %13 = arith.maximumf %11, %12 : vector<256x128xf32>
    %14 = arith.addf %13, %5 : vector<256x128xf32>
    %c0_10 = arith.constant 0 : index
    %c0_11 = arith.constant 0 : index
    %15 = vector.load %arg7[%c0_10, %c0_11] : memref<256x128xf32, #tpu.memory_space<vmem>>, vector<256x128xf32>
    tpu.vector_store %arg7[%c0_10, %c0_11], %14 {strides = array<i32>} : memref<256x128xf32, #tpu.memory_space<vmem>>, vector<256x128xf32>,
    return
  }
  func.func @transform_0(%arg0: i32, %arg1: i32) -> (i32, i32) {
    %c0_i32 = arith.constant 0 : i32
    %c0_i32_0 = arith.constant 0 : i32
    return %arg1, %c0_i32 : i32, i32
  }
  func.func @transform_1(%arg0: i32, %arg1: i32) -> (i32, i32) {
    %c0_i32 = arith.constant 0 : i32
    %c0_i32_0 = arith.constant 0 : i32
    return %c0_i32, %arg0 : i32, i32
  }
  func.func @transform_2(%arg0: i32, %arg1: i32) -> (i32, i32) {
    %c0_i32 = arith.constant 0 : i32
    %c0_i32_0 = arith.constant 0 : i32
    return %c0_i32, %arg0 : i32, i32
  }
  func.func @transform_3(%arg0: i32, %arg1: i32) -> (i32, i32) {
    %c0_i32 = arith.constant 0 : i32
    %c0_i32_0 = arith.constant 0 : i32
    return %c0_i32, %arg0 : i32, i32
  }
  func.func @transform_4(%arg0: i32, %arg1: i32) -> (i32, i32) {
    %c0_i32 = arith.constant 0 : i32
    %c0_i32_0 = arith.constant 0 : i32
    return %c0_i32, %arg0 : i32, i32
  }
  func.func @transform_5(%arg0: i32, %arg1: i32) -> (i32, i32) {
    %c0_i32 = arith.constant 0 : i32
    return %arg1, %arg0 : i32, i32
  }
}

</mosaic_0001>

<bundles_post_ra>
// kernel: residual_block.1
= control target key start
LH: loop header
LB: loop body
LE: loop exit
PB: predicated region body
PF: predicated region fallthrough
CT: control target
= control target key end

     0   :  { %s1200_s18 = smov 0   ;;  %s1202_s19 = smov 0   ;;  %s1424_s0 = inlined_call_operand.vmem [shape: bf16[512,128], index: 0, kind: input, shape index: {}]   ;;  %s1425_s1 = inlined_call_operand.vmem [shape: bf16[128,128], index: 1, kind: input, shape index: {}]   ;;  %s1426_s2 = inlined_call_operand.vmem [shape: f32[1,128], index: 2, kind: input, shape index: {}]   ;;  %s1427_s3 = inlined_call_operand.vmem [shape: f32[1,128], index: 3, kind: input, shape index: {}]   ;;  %s1428_s4 = inlined_call_operand.vmem [shape: f32[1,128], index: 4, kind: input, shape index: {}]   ;;  %s1429_s5 = inlined_call_operand.vmem [shape: f32[512,128], index: 5, kind: output, shape index: {}]  }
   0x1   :  { %s1204_s20 = smov 0  }
   0x2 LB: > { %s24_s21 = sadd.s32 1, %s1164_s19  ;;  %p976_p0 = scmp.ge.s32.totalorder %s1168_s20, 1  ;;  %s1168_s20 = sphi %s1204_s20, %s15_s20   ;;  %s1164_s19 = sphi %s1202_s19, %s1431_s19   ;;  %s1160_s18 = sphi %s1200_s18, %s1430_s18  }
   0x3   : > { %p25_p1 = scmp.ge.s32.totalorder %s24_s21, 2  ;;  %p235_p2 = scmp.lt.s32.totalorder %s1168_s20, 3 }
   0x5   : > { %s1433_s21 = smov (%p25_p1, %s24_s21), 0  ;;  %p236_p3 = pnand %p976_p0, %p235_p2 }
   0x6   : > { %v1122_v0 = vld [vmem:[%s1425_s1] sm:$0xff] (!%p236_p3)   ;;  %s977_s24 = sshll.u32 (!%p236_p3), %s1160_s18, 5  ;;  %v1123_v1 = vld [vmem:[%s1425_s1 + $0x8] sm:$0xff] (!%p236_p3)   ;;  %v1124_v2 = vld [vmem:[%s1425_s1 + $0x10] sm:$0xff] (!%p236_p3)  }
   0x7   : > { %239 = sbr.rel (%p236_p3) target bundleno = 298 (0x12a), region = 40  ;;  %p280_p4 = scmp.lt.s32.totalorder (!%p236_p3), %s977_s24, 63  ;;  %1034 = vmatprep.subr.bf16.mxu0 (!%p236_p3), %v1122_v0  ;;  %1082 = vmatprep.subr.bf16.mxu1 (!%p236_p3), %v1122_v0  ;;  %v1125_v3 = vld [vmem:[%s1425_s1 + $0x18] sm:$0xff] (!%p236_p3)   ;;  %v1126_v6 = vld [vmem:[%s1425_s1 + $0x20] sm:$0xff] (!%p236_p3)   ;;  %v1127_v7 = vld [vmem:[%s1425_s1 + $0x28] sm:$0xff] (!%p236_p3)  }
   0x8   : > { %1035 = vmatpush3.bf16.msra.mxu0 (!%p236_p3), %v1122_v0  ;;  %1090 = vmatpush3.bf16.msra.mxu1 (!%p236_p3), %v1122_v0  ;;  %v1128_v8 = vld [vmem:[%s1425_s1 + $0x30] sm:$0xff] (!%p236_p3)   ;;  %v1129_v9 = vld [vmem:[%s1425_s1 + $0x38] sm:$0xff] (!%p236_p3)   ;;  %v1269_v24 = vld [vmem:[%s1426_s2] ss:$0 sm:$0xff] (!%p236_p3) }
   0x9   : > { %1036 = vmatprep.subr.bf16.mxu0 (!%p236_p3), %v1123_v1  ;;  %1083 = vmatprep.subr.bf16.mxu1 (!%p236_p3), %v1123_v1  ;;  %v1274_v26 = vld [vmem:[%s1427_s3] ss:$0 sm:$0xff] (!%p236_p3) }
   0xa   : > { %v1281_v32 = vld [vmem:[%s1428_s4] ss:$0 sm:$0xff] (!%p236_p3) }
   0xc   : > { %1037 = vmatpush3.bf16.msra.mxu0 (!%p236_p3), %v1123_v1  ;;  %1091 = vmatpush3.bf16.msra.mxu1 (!%p236_p3), %v1123_v1 }
   0xd   : > { %1038 = vmatprep.subr.bf16.mxu0 (!%p236_p3), %v1124_v2  ;;  %1084 = vmatprep.subr.bf16.mxu1 (!%p236_p3), %v1124_v2 }
   0xe   : > { %s1435_s24 = smov (!%p280_p4, %s977_s24), 63 }
   0xf   : > { %s978_s29 = sshll.u32 %s1435_s24, 2  ;;  %s980_s28 = sshll.u32 %s1435_s24, 3 }
  0x10   : > { %s1233_s7 = scalar_lea.vmem %s1424_s0, %s978_s29  ;;  %1039 = vmatpush3.bf16.msra.mxu0 %v1124_v2  ;;  %1092 = vmatpush3.bf16.msra.mxu1 %v1124_v2  ;;  %s1307_s30 = scalar_lea.vmem %s1429_s5, %s980_s28 }
  0x11   : > { %v1130_v4 = vld [vmem:[%s1233_s7] sm:$0xff]   ;;  %1040 = vmatprep.subr.bf16.mxu0 %v1125_v3  ;;  %1085 = vmatprep.subr.bf16.mxu1 %v1125_v3  ;;  %v1132_v10 = vld [vmem:[%s1233_s7 + $0x8] sm:$0xff]   ;;  %v1134_v12 = vld [vmem:[%s1233_s7 + $0x10] sm:$0xff]  }
  0x12   : > { %v1131_v5 = vld [vmem:[%s1233_s7 + $0x40] sm:$0xff]   ;;  %1050 = vmatprep.mubr.bf16.mxu0 %v1130_v4  ;;  %v1133_v11 = vld [vmem:[%s1233_s7 + $0x48] sm:$0xff]   ;;  %v1135_v13 = vld [vmem:[%s1233_s7 + $0x50] sm:$0xff]  }
  0x13   : > { %1066 = vmatprep.mubr.bf16.mxu1 %v1131_v5  ;;  %v1136_v14 = vld [vmem:[%s1233_s7 + $0x18] sm:$0xff]   ;;  %v1138_v16 = vld [vmem:[%s1233_s7 + $0x20] sm:$0xff]   ;;  %v1140_v18 = vld [vmem:[%s1233_s7 + $0x28] sm:$0xff]  }
  0x14   : > { %1041 = vmatpush3.bf16.msra.mxu0 %v1125_v3  ;;  %1093 = vmatpush3.bf16.msra.mxu1 %v1125_v3  ;;  %v1137_v15 = vld [vmem:[%s1233_s7 + $0x58] sm:$0xff]   ;;  %v1139_v17 = vld [vmem:[%s1233_s7 + $0x60] sm:$0xff]   ;;  %v1141_v19 = vld [vmem:[%s1233_s7 + $0x68] sm:$0xff]  }
  0x15   : > { %1042 = vmatprep.subr.bf16.mxu0 %v1126_v6  ;;  %1086 = vmatprep.subr.bf16.mxu1 %v1126_v6  ;;  %v1142_v20 = vld [vmem:[%s1233_s7 + $0x30] sm:$0xff]   ;;  %v1144_v22 = vld [vmem:[%s1233_s7 + $0x38] sm:$0xff]  }
  0x16   : > { %v1143_v21 = vld [vmem:[%s1233_s7 + $0x70] sm:$0xff]   ;;  %v1145_v23 = vld [vmem:[%s1233_s7 + $0x78] sm:$0xff]  }
  0x18   : > { %1043 = vmatpush3.bf16.msra.mxu0 %v1126_v6  ;;  %1094 = vmatpush3.bf16.msra.mxu1 %v1126_v6 }
  0x19   : > { %1044 = vmatprep.subr.bf16.mxu0 %v1127_v7  ;;  %1087 = vmatprep.subr.bf16.mxu1 %v1127_v7 }
  0x1c   : > { %1045 = vmatpush3.bf16.msra.mxu0 %v1127_v7  ;;  %1095 = vmatpush3.bf16.msra.mxu1 %v1127_v7 }
  0x1d   : > { %1046 = vmatprep.subr.bf16.mxu0 %v1128_v8  ;;  %1088 = vmatprep.subr.bf16.mxu1 %v1128_v8 }
  0x20   : > { %1047 = vmatpush3.bf16.msra.mxu0 %v1128_v8  ;;  %1096 = vmatpush3.bf16.msra.mxu1 %v1128_v8 }
  0x21   : > { %1048 = vmatprep.subr.bf16.mxu0 %v1129_v9  ;;  %1089 = vmatprep.subr.bf16.mxu1 %v1129_v9 }
  0x24   : > { %1049 = vmatpush3.bf16.msra.mxu0 %v1129_v9  ;;  %1097 = vmatpush3.bf16.msra.mxu1 %v1129_v9 }
  0x27   : > { %1051 = vmatmul.mubr.bf16.vlgmr.msra.gmra.mrb[0].mxu0 %v1132_v10  ;;  %1067 = vmatmul.mubr.bf16.vlgmr.msra.gmra.mrb[0].mxu1 %v1133_v11 }
  0x28   : > { %1054 = vmatprep.mubr.bf16.mxu0 %v1134_v12  ;;  %1070 = vmatprep.mubr.bf16.mxu1 %v1135_v13 }
  0x2f   : > { %1055 = vmatmul.mubr.bf16.gmra.mrb[4].mxu0 %v1136_v14  ;;  %1071 = vmatmul.mubr.bf16.gmra.mrb[4].mxu1 %v1137_v15 }
  0x30   : > { %1058 = vmatprep.mubr.bf16.mxu0 %v1138_v16  ;;  %1074 = vmatprep.mubr.bf16.mxu1 %v1139_v17 }
  0x37   : > { %1059 = vmatmul.mubr.bf16.gmra.mrb[8].mxu0 %v1140_v18  ;;  %1075 = vmatmul.mubr.bf16.gmra.mrb[8].mxu1 %v1141_v19 }
  0x38   : > { %1062 = vmatprep.mubr.bf16.mxu0 %v1142_v20  ;;  %1078 = vmatprep.mubr.bf16.mxu1 %v1143_v21 }
  0x3f   : > { %1063 = vmatmul.mubr.bf16.gmra.mrb[12].mxu0 %v1144_v22  ;;  %1079 = vmatmul.mubr.bf16.gmra.mrb[12].mxu1 %v1145_v23 }
  0xfa   : > { %v1052_v25 = vpop.f32.mrb[0].mxu0  ;;  %v1068_v27 = vpop.f32.mrb[0].mxu1 }
  0xfb   : > { %v550_v28 = vadd.f32 %v1052_v25, %v1269_v24  ;;  %v614_v29 = vadd.f32 %v1068_v27, %v1269_v24  ;;  %v541_v30 = vpop.f32.mrb[1].mxu0  ;;  %v605_v31 = vpop.f32.mrb[1].mxu1 }
  0xfc   : > { %v542_v33 = vadd.f32 %v1269_v24, %v541_v30  ;;  %v606_v34 = vadd.f32 %v1269_v24, %v605_v31  ;;  %v1053_v35 = vpop.f32.mrb[2].mxu0  ;;  %v1069_v36 = vpop.f32.mrb[2].mxu1 }
  0xfd   : > { %v677_v37 = vmul.f32 %v1274_v26, %v550_v28  ;;  %v693_v38 = vmul.f32 %v1274_v26, %v614_v29  ;;  %v553_v39 = vadd.f32 %v1053_v35, %v1269_v24  ;;  %v617_v40 = vadd.f32 %v1069_v36, %v1269_v24  ;;  %v544_v41 = vpop.f32.mrb[3].mxu0  ;;  %v608_v42 = vpop.f32.mrb[3].mxu1 }
  0xfe   : > { %v675_v43 = vmul.f32 %v1274_v26, %v542_v33  ;;  %v691_v44 = vmul.f32 %v1274_v26, %v606_v34  ;;  %v545_v45 = vadd.f32 %v1269_v24, %v544_v41  ;;  %v609_v46 = vadd.f32 %v1269_v24, %v608_v42 }
  0xff   : > { %v716_v47 = vadd.f32 %v1281_v32, %v677_v37  ;;  %v732_v48 = vadd.f32 %v1281_v32, %v693_v38  ;;  %v678_v49 = vmul.f32 %v1274_v26, %v553_v39  ;;  %v694_v50 = vmul.f32 %v1274_v26, %v617_v40 }
 0x100   : > { %v714_v51 = vadd.f32 %v1281_v32, %v675_v43  ;;  %v730_v52 = vadd.f32 %v1281_v32, %v691_v44  ;;  %v676_v53 = vmul.f32 %v1274_v26, %v545_v45  ;;  %v692_v54 = vmul.f32 %v1274_v26, %v609_v46 }
 0x101   : > { %v748_v55 = vmax.f32 %v716_v47, 0.0  ;;  %v764_v56 = vmax.f32 %v732_v48, 0.0  ;;  %v717_v57 = vadd.f32 %v1281_v32, %v678_v49  ;;  %v733_v58 = vadd.f32 %v1281_v32, %v694_v50 }
 0x102   : > { %v746_v59 = vmax.f32 %v714_v51, 0.0  ;;  %v762_v60 = vmax.f32 %v730_v52, 0.0  ;;  %v715_v61 = vadd.f32 %v1281_v32, %v676_v53  ;;  %v731_v62 = vadd.f32 %v1281_v32, %v692_v54  ;;  %v1056_v63 = vpop.f32.mrb[4].mxu0  ;;  %v1072_v0 = vpop.f32.mrb[4].mxu1 }
 0x103   : > { %v780_v1 = vadd.f32 %v748_v55, %v550_v28  ;;  %v796_v2 = vadd.f32 %v764_v56, %v614_v29  ;;  %v749_v3 = vmax.f32 %v717_v57, 0.0  ;;  %v765_v4 = vmax.f32 %v733_v58, 0.0  ;;  %v557_v5 = vpop.f32.mrb[5].mxu0  ;;  %v621_v6 = vpop.f32.mrb[5].mxu1 }
 0x104   : > { %v778_v7 = vadd.f32 %v746_v59, %v542_v33  ;;  %v794_v8 = vadd.f32 %v762_v60, %v606_v34  ;;  %v747_v9 = vmax.f32 %v715_v61, 0.0  ;;  %v763_v10 = vmax.f32 %v731_v62, 0.0  ;;  %v1057_v11 = vpop.f32.mrb[6].mxu0  ;;  %v1073_v12 = vpop.f32.mrb[6].mxu1 }
 0x105   : > { %812 = vst [vmem:[%s1307_s30 + $0x10] sm:$0xff] %v780_v1  ;;  %828 = vst [vmem:[%s1307_s30 + $0x90] sm:$0xff] %v796_v2  ;;  %v781_v13 = vadd.f32 %v749_v3, %v553_v39  ;;  %v797_v14 = vadd.f32 %v765_v4, %v617_v40  ;;  %v566_v15 = vadd.f32 %v1056_v63, %v1269_v24  ;;  %v560_v17 = vpop.f32.mrb[7].mxu0  ;;  %v624_v18 = vpop.f32.mrb[7].mxu1 }
 0x106   : > { %v630_v16 = vadd.f32 %v1072_v0, %v1269_v24  ;;  %810 = vst [vmem:[%s1307_s30] sm:$0xff] %v778_v7  ;;  %826 = vst [vmem:[%s1307_s30 + $0x80] sm:$0xff] %v794_v8  ;;  %v779_v19 = vadd.f32 %v747_v9, %v545_v45  ;;  %v795_v20 = vadd.f32 %v763_v10, %v609_v46 }
 0x107   : > { %v558_v21 = vadd.f32 %v1269_v24, %v557_v5  ;;  %v622_v22 = vadd.f32 %v1269_v24, %v621_v6  ;;  %813 = vst [vmem:[%s1307_s30 + $0x18] sm:$0xff] %v781_v13  ;;  %829 = vst [vmem:[%s1307_s30 + $0x98] sm:$0xff] %v797_v14  ;;  %v681_v23 = vmul.f32 %v1274_v26, %v566_v15 }
 0x108   : > { %v697_v25 = vmul.f32 %v1274_v26, %v630_v16  ;;  %v569_v27 = vadd.f32 %v1057_v11, %v1269_v24  ;;  %v633_v28 = vadd.f32 %v1073_v12, %v1269_v24  ;;  %811 = vst [vmem:[%s1307_s30 + $0x8] sm:$0xff] %v779_v19  ;;  %827 = vst [vmem:[%s1307_s30 + $0x88] sm:$0xff] %v795_v20 }
 0x109   : > { %v679_v29 = vmul.f32 %v1274_v26, %v558_v21  ;;  %v695_v30 = vmul.f32 %v1274_v26, %v622_v22  ;;  %v561_v31 = vadd.f32 %v1269_v24, %v560_v17  ;;  %v625_v33 = vadd.f32 %v1269_v24, %v624_v18 }
 0x10a   : > { %v720_v34 = vadd.f32 %v1281_v32, %v681_v23  ;;  %v736_v35 = vadd.f32 %v1281_v32, %v697_v25  ;;  %v682_v36 = vmul.f32 %v1274_v26, %v569_v27  ;;  %v698_v37 = vmul.f32 %v1274_v26, %v633_v28  ;;  %v1060_v42 = vpop.f32.mrb[8].mxu0  ;;  %v1076_v43 = vpop.f32.mrb[8].mxu1 }
 0x10b   : > { %v718_v38 = vadd.f32 %v1281_v32, %v679_v29  ;;  %v734_v39 = vadd.f32 %v1281_v32, %v695_v30  ;;  %v680_v40 = vmul.f32 %v1274_v26, %v561_v31  ;;  %v696_v41 = vmul.f32 %v1274_v26, %v625_v33  ;;  %v573_v48 = vpop.f32.mrb[9].mxu0  ;;  %v637_v49 = vpop.f32.mrb[9].mxu1 }
 0x10c   : > { %v752_v44 = vmax.f32 %v720_v34, 0.0  ;;  %v768_v45 = vmax.f32 %v736_v35, 0.0  ;;  %v721_v46 = vadd.f32 %v1281_v32, %v682_v36  ;;  %v737_v47 = vadd.f32 %v1281_v32, %v698_v37  ;;  %v1061_v54 = vpop.f32.mrb[10].mxu0  ;;  %v1077_v55 = vpop.f32.mrb[10].mxu1 }
 0x10d   : > { %v750_v50 = vmax.f32 %v718_v38, 0.0  ;;  %v766_v51 = vmax.f32 %v734_v39, 0.0  ;;  %v719_v52 = vadd.f32 %v1281_v32, %v680_v40  ;;  %v735_v53 = vadd.f32 %v1281_v32, %v696_v41  ;;  %v576_v60 = vpop.f32.mrb[11].mxu0  ;;  %v640_v61 = vpop.f32.mrb[11].mxu1 }
 0x10e   : > { %v784_v56 = vadd.f32 %v752_v44, %v566_v15  ;;  %v800_v57 = vadd.f32 %v768_v45, %v630_v16  ;;  %v753_v58 = vmax.f32 %v721_v46, 0.0  ;;  %v769_v59 = vmax.f32 %v737_v47, 0.0 }
 0x10f   : > { %v782_v62 = vadd.f32 %v750_v50, %v558_v21  ;;  %v798_v63 = vadd.f32 %v766_v51, %v622_v22  ;;  %v751_v0 = vmax.f32 %v719_v52, 0.0  ;;  %v767_v1 = vmax.f32 %v735_v53, 0.0 }
 0x110   : > { %816 = vst [vmem:[%s1307_s30 + $0x30] sm:$0xff] %v784_v56  ;;  %832 = vst [vmem:[%s1307_s30 + $0xb0] sm:$0xff] %v800_v57  ;;  %v785_v2 = vadd.f32 %v753_v58, %v569_v27  ;;  %v801_v3 = vadd.f32 %v769_v59, %v633_v28  ;;  %v582_v4 = vadd.f32 %v1060_v42, %v1269_v24 }
 0x111   : > { %v646_v5 = vadd.f32 %v1076_v43, %v1269_v24  ;;  %814 = vst [vmem:[%s1307_s30 + $0x20] sm:$0xff] %v782_v62  ;;  %830 = vst [vmem:[%s1307_s30 + $0xa0] sm:$0xff] %v798_v63  ;;  %v783_v6 = vadd.f32 %v751_v0, %v561_v31  ;;  %v799_v7 = vadd.f32 %v767_v1, %v625_v33 }
 0x112   : > { %v574_v8 = vadd.f32 %v1269_v24, %v573_v48  ;;  %v638_v9 = vadd.f32 %v1269_v24, %v637_v49  ;;  %817 = vst [vmem:[%s1307_s30 + $0x38] sm:$0xff] %v785_v2  ;;  %833 = vst [vmem:[%s1307_s30 + $0xb8] sm:$0xff] %v801_v3  ;;  %v685_v10 = vmul.f32 %v1274_v26, %v582_v4  ;;  %v1064_v18 = vpop.f32.mrb[12].mxu0  ;;  %v1080_v19 = vpop.f32.mrb[12].mxu1 }
 0x113   : > { %v701_v11 = vmul.f32 %v1274_v26, %v646_v5  ;;  %v585_v12 = vadd.f32 %v1061_v54, %v1269_v24  ;;  %v649_v13 = vadd.f32 %v1077_v55, %v1269_v24  ;;  %815 = vst [vmem:[%s1307_s30 + $0x28] sm:$0xff] %v783_v6  ;;  %831 = vst [vmem:[%s1307_s30 + $0xa8] sm:$0xff] %v799_v7  ;;  %v589_v25 = vpop.f32.mrb[13].mxu0  ;;  %v653_v27 = vpop.f32.mrb[13].mxu1 }
 0x114   : > { %v683_v14 = vmul.f32 %v1274_v26, %v574_v8  ;;  %v699_v15 = vmul.f32 %v1274_v26, %v638_v9  ;;  %v577_v16 = vadd.f32 %v1269_v24, %v576_v60  ;;  %v641_v17 = vadd.f32 %v1269_v24, %v640_v61  ;;  %v1065_v33 = vpop.f32.mrb[14].mxu0  ;;  %v1081_v34 = vpop.f32.mrb[14].mxu1 }
 0x115   : > { %v724_v20 = vadd.f32 %v1281_v32, %v685_v10  ;;  %v740_v21 = vadd.f32 %v1281_v32, %v701_v11  ;;  %v686_v22 = vmul.f32 %v1274_v26, %v585_v12  ;;  %v702_v23 = vmul.f32 %v1274_v26, %v649_v13  ;;  %v592_v39 = vpop.f32.mrb[15].mxu0  ;;  %v656_v40 = vpop.f32.mrb[15].mxu1 }
 0x116   : > { %v722_v28 = vadd.f32 %v1281_v32, %v683_v14  ;;  %v738_v29 = vadd.f32 %v1281_v32, %v699_v15  ;;  %v684_v30 = vmul.f32 %v1274_v26, %v577_v16  ;;  %v700_v31 = vmul.f32 %v1274_v26, %v641_v17 }
 0x117   : > { %v756_v35 = vmax.f32 %v724_v20, 0.0  ;;  %v772_v36 = vmax.f32 %v740_v21, 0.0  ;;  %v725_v37 = vadd.f32 %v1281_v32, %v686_v22  ;;  %v741_v38 = vadd.f32 %v1281_v32, %v702_v23 }
 0x118   : > { %v754_v41 = vmax.f32 %v722_v28, 0.0  ;;  %v770_v42 = vmax.f32 %v738_v29, 0.0  ;;  %v723_v43 = vadd.f32 %v1281_v32, %v684_v30  ;;  %v739_v44 = vadd.f32 %v1281_v32, %v700_v31 }
 0x119   : > { %v788_v45 = vadd.f32 %v756_v35, %v582_v4  ;;  %v804_v46 = vadd.f32 %v772_v36, %v646_v5  ;;  %v757_v47 = vmax.f32 %v725_v37, 0.0  ;;  %v773_v48 = vmax.f32 %v741_v38, 0.0 }
 0x11a   : > { %v786_v49 = vadd.f32 %v754_v41, %v574_v8  ;;  %v802_v50 = vadd.f32 %v770_v42, %v638_v9  ;;  %v755_v51 = vmax.f32 %v723_v43, 0.0  ;;  %v771_v52 = vmax.f32 %v739_v44, 0.0 }
 0x11b   : > { %820 = vst [vmem:[%s1307_s30 + $0x50] sm:$0xff] %v788_v45  ;;  %836 = vst [vmem:[%s1307_s30 + $0xd0] sm:$0xff] %v804_v46  ;;  %v789_v53 = vadd.f32 %v757_v47, %v585_v12  ;;  %v805_v54 = vadd.f32 %v773_v48, %v649_v13  ;;  %v598_v55 = vadd.f32 %v1064_v18, %v1269_v24 }
 0x11c   : > { %v662_v56 = vadd.f32 %v1080_v19, %v1269_v24  ;;  %818 = vst [vmem:[%s1307_s30 + $0x40] sm:$0xff] %v786_v49  ;;  %834 = vst [vmem:[%s1307_s30 + $0xc0] sm:$0xff] %v802_v50  ;;  %v787_v57 = vadd.f32 %v755_v51, %v577_v16  ;;  %v803_v58 = vadd.f32 %v771_v52, %v641_v17 }
 0x11d   : > { %v590_v59 = vadd.f32 %v1269_v24, %v589_v25  ;;  %v654_v60 = vadd.f32 %v1269_v24, %v653_v27  ;;  %821 = vst [vmem:[%s1307_s30 + $0x58] sm:$0xff] %v789_v53  ;;  %837 = vst [vmem:[%s1307_s30 + $0xd8] sm:$0xff] %v805_v54  ;;  %v689_v61 = vmul.f32 %v1274_v26, %v598_v55 }
 0x11e   : > { %v705_v62 = vmul.f32 %v1274_v26, %v662_v56  ;;  %v601_v63 = vadd.f32 %v1065_v33, %v1269_v24  ;;  %v665_v0 = vadd.f32 %v1081_v34, %v1269_v24  ;;  %819 = vst [vmem:[%s1307_s30 + $0x48] sm:$0xff] %v787_v57  ;;  %835 = vst [vmem:[%s1307_s30 + $0xc8] sm:$0xff] %v803_v58 }
 0x11f   : > { %v687_v1 = vmul.f32 %v1274_v26, %v590_v59  ;;  %v703_v2 = vmul.f32 %v1274_v26, %v654_v60  ;;  %v593_v3 = vadd.f32 %v1269_v24, %v592_v39  ;;  %v657_v4 = vadd.f32 %v1269_v24, %v656_v40 }
 0x120   : > { %v728_v5 = vadd.f32 %v1281_v32, %v689_v61  ;;  %v744_v6 = vadd.f32 %v1281_v32, %v705_v62  ;;  %v690_v7 = vmul.f32 %v1274_v26, %v601_v63  ;;  %v706_v8 = vmul.f32 %v1274_v26, %v665_v0 }
 0x121   : > { %v726_v9 = vadd.f32 %v1281_v32, %v687_v1  ;;  %v742_v10 = vadd.f32 %v1281_v32, %v703_v2  ;;  %v688_v11 = vmul.f32 %v1274_v26, %v593_v3  ;;  %v704_v12 = vmul.f32 %v1274_v26, %v657_v4 }
 0x122   : > { %v760_v13 = vmax.f32 %v728_v5, 0.0  ;;  %v776_v14 = vmax.f32 %v744_v6, 0.0  ;;  %v729_v24 = vadd.f32 %v1281_v32, %v690_v7  ;;  %v745_v15 = vadd.f32 %v1281_v32, %v706_v8 }
 0x123   : > { %v758_v16 = vmax.f32 %v726_v9, 0.0  ;;  %v774_v17 = vmax.f32 %v742_v10, 0.0  ;;  %v727_v18 = vadd.f32 %v1281_v32, %v688_v11  ;;  %v743_v19 = vadd.f32 %v1281_v32, %v704_v12 }
 0x124   : > { %v792_v20 = vadd.f32 %v760_v13, %v598_v55  ;;  %v808_v21 = vadd.f32 %v776_v14, %v662_v56  ;;  %v761_v26 = vmax.f32 %v729_v24, 0.0  ;;  %v777_v22 = vmax.f32 %v745_v15, 0.0 }
 0x125   : > { %v790_v23 = vadd.f32 %v758_v16, %v590_v59  ;;  %v806_v25 = vadd.f32 %v774_v17, %v654_v60  ;;  %v759_v27 = vmax.f32 %v727_v18, 0.0  ;;  %v775_v28 = vmax.f32 %v743_v19, 0.0 }
 0x126   : > { %824 = vst [vmem:[%s1307_s30 + $0x70] sm:$0xff] %v792_v20  ;;  %840 = vst [vmem:[%s1307_s30 + $0xf0] sm:$0xff] %v808_v21  ;;  %v793_v29 = vadd.f32 %v761_v26, %v601_v63  ;;  %v809_v30 = vadd.f32 %v777_v22, %v665_v0 }
 0x127   : > { %822 = vst [vmem:[%s1307_s30 + $0x60] sm:$0xff] %v790_v23  ;;  %838 = vst [vmem:[%s1307_s30 + $0xe0] sm:$0xff] %v806_v25  ;;  %v791_v31 = vadd.f32 %v759_v27, %v593_v3  ;;  %v807_v32 = vadd.f32 %v775_v28, %v657_v4 }
 0x128   : > { %825 = vst [vmem:[%s1307_s30 + $0x78] sm:$0xff] %v793_v29  ;;  %841 = vst [vmem:[%s1307_s30 + $0xf8] sm:$0xff] %v809_v30 }
 0x129   : > { %823 = vst [vmem:[%s1307_s30 + $0x68] sm:$0xff] %v791_v31  ;;  %839 = vst [vmem:[%s1307_s30 + $0xe8] sm:$0xff] %v807_v32 }
 0x12a PF: > { %s15_s20 = sadd.s32 1, %s1168_s20   ;;  %s1430_s18 = smov %s1164_s19 }
 0x12b   : > { %p12_p5 = scmp.ge.s32.totalorder %s15_s20, 4   ;;  %s1431_s19 = smov %s1433_s21 }
 0x12d   :  { %14 = sbr.rel (!%p12_p5) target bundleno = 2 (0x2), region = 82 }

</bundles_post_ra>
